<compile_context>
chip_gen: v6e
topology: v6e:2x2x1
jax: 0.10.0
libtpu: 0.0.40
codegen_flags: <defaults>
</compile_context>

<pallas_src>
import functools

import jax
import jax.numpy as jnp
from jax.experimental import pallas as pl
from jax.experimental.pallas import tpu as pltpu

_LANE = 128
_ROW_ALIGN = 16          # covers bf16 sublane packing (16 x 128) for the outputs
_SUBLANE = 8
_VMEM_BUDGET = 40 << 20  # pipeline-buffer budget; leaves headroom in v7x's 64 MiB


def _round_up(x, m):
    return ((x + m - 1) // m) * m


def _encdec_kernel(emb_ref,                         # [TILE_B, Dp] f32 (streamed)
                   w1_ref, w2_ref, w3_ref, w4_ref,  # bf16, padded, VMEM-resident
                   bias_ref,                        # [8, Lmax] f32: rows = b1,b2,b3,b4
                   enc_ref, dec_ref,                # outputs, lane-padded
                   *, dp, hp, mp):
    bf16 = jnp.bfloat16
    f32 = jnp.float32

    emb_f32 = emb_ref[...].astype(f32)              # full-precision residual path
    emb_bf = emb_f32.astype(bf16)                   # MXU operand (VPU cast, ~free)

    bias = bias_ref[...]                            # one packed DMA for all biases
    b1 = bias[0:1, :hp]
    b2 = bias[1:2, :dp]
    b3 = bias[2:3, :hp]
    b4 = bias[3:4, :mp]

    # ---- Encoder: residual 2-layer MLP (f32 elementwise path) ----
    h1 = jnp.dot(emb_bf, w1_ref[...], preferred_element_type=f32) + b1
    h1 = jnp.maximum(h1, 0.0)
    enc = jnp.dot(h1.astype(bf16), w2_ref[...], preferred_element_type=f32) + b2
    enc = enc + emb_f32
    enc_ref[...] = enc.astype(enc_ref.dtype)

    # ---- Decoder: 2-layer MLP -> sigmoid message (uses full-f32 enc) ----
    h2 = jnp.dot(enc.astype(bf16), w3_ref[...], preferred_element_type=f32) + b3
    h2 = jnp.maximum(h2, 0.0)
    logits = jnp.dot(h2.astype(bf16), w4_ref[...], preferred_element_type=f32) + b4
    dec_ref[...] = jax.nn.sigmoid(logits).astype(dec_ref.dtype)


def encoder_decoder(embedding, params, *, tile_b=2048,
                    enc_dtype=jnp.bfloat16, dec_dtype=jnp.float32):
    """embedding: [B, D] float32.

    Returns (encoded_emb [B, D] in enc_dtype, decoded_message [B, M] in dec_dtype).
    """
    B, D = embedding.shape
    H = params["w1"].shape[1]
    M = params["b4"].shape[-1]

    # Lane-pad every feature dim to a multiple of 128 (zero padding is exact:
    # zero weight rows/cols and ReLU(0)=0 leave the valid region untouched).
    Dp = _round_up(D, _LANE)
    Hp = _round_up(H, _LANE)
    Mp = _round_up(M, _LANE)
    Lmax = max(Dp, Hp, Mp)

    # --- batch tiling: big, balanced, VMEM-aware tiles --------------------
    in_isz = jnp.dtype(embedding.dtype).itemsize
    enc_isz = jnp.dtype(enc_dtype).itemsize
    dec_isz = jnp.dtype(dec_dtype).itemsize
    per_row = 2 * (Dp * in_isz + Dp * enc_isz + Mp * dec_isz)     # double-buffered streams
    w_bytes = 2 * (3 * Dp * Hp + Hp * Mp) * 2                     # bf16 weights x2 buffers
    avail = max(_VMEM_BUDGET - w_bytes - (1 << 20), per_row * _ROW_ALIGN)
    vmem_cap = max(_ROW_ALIGN, (avail // per_row) // _ROW_ALIGN * _ROW_ALIGN)
    tile_cap = max(_ROW_ALIGN, min(tile_b, vmem_cap))

    B_aln = _round_up(max(B, 1), _ROW_ALIGN)
    min_tiles = 2 if B_aln >= 2 * _ROW_ALIGN else 1   # v7x: give both TCs a tile
    n_tiles = max(pl.cdiv(B_aln, tile_cap), min_tiles)
    TILE_B = _round_up(pl.cdiv(B_aln, n_tiles), _ROW_ALIGN)
    n_tiles = pl.cdiv(B_aln, TILE_B)
    Bp = n_tiles * TILE_B                              # waste <= 16*n_tiles - B rows

    # --- parameter prep ----------------------------------------------------
    pad2 = lambda w, r, c: jnp.pad(w, ((0, r - w.shape[0]), (0, c - w.shape[1])))
    w1 = pad2(params["w1"], Dp, Hp).astype(jnp.bfloat16)
    w2 = pad2(params["w2"], Hp, Dp).astype(jnp.bfloat16)
    w3 = pad2(params["w3"], Dp, Hp).astype(jnp.bfloat16)
    w4 = pad2(params["w4"], Hp, Mp).astype(jnp.bfloat16)

    # Pack the four bias vectors into a single (8, Lmax) f32 tile -> 1 DMA.
    bias = jnp.zeros((_SUBLANE, Lmax), jnp.float32)
    bias = bias.at[0, :H].set(params["b1"].reshape(-1))
    bias = bias.at[1, :D].set(params["b2"].reshape(-1))
    bias = bias.at[2, :H].set(params["b3"].reshape(-1))
    bias = bias.at[3, :M].set(params["b4"].reshape(-1))

    # Stream the embedding in its original dtype; pad only if shapes require it
    # (no wrapper-side cast pass, residual stays f32-accurate).
    if Bp != B or Dp != D:
        emb = jnp.pad(embedding, ((0, Bp - B), (0, Dp - D)))
    else:
        emb = embedding

    kernel = functools.partial(_encdec_kernel, dp=Dp, hp=Hp, mp=Mp)

    # Grid-invariant block index -> weights stay resident in VMEM, no re-DMA.
    resident = lambda shape: pl.BlockSpec(shape, lambda i: (0, 0))

    enc_p, dec_p = pl.pallas_call(
        kernel,
        grid=(n_tiles,),
        in_specs=[
            pl.BlockSpec((TILE_B, Dp), lambda i: (i, 0)),   # streamed embedding tile
            resident((Dp, Hp)),
            resident((Hp, Dp)),
            resident((Dp, Hp)),
            resident((Hp, Mp)),
            resident((_SUBLANE, Lmax)),
        ],
        out_specs=(
            pl.BlockSpec((TILE_B, Dp), lambda i: (i, 0)),
            pl.BlockSpec((TILE_B, Mp), lambda i: (i, 0)),
        ),
        out_shape=(
            jax.ShapeDtypeStruct((Bp, Dp), enc_dtype),
            jax.ShapeDtypeStruct((Bp, Mp), dec_dtype),
        ),
        compiler_params=pltpu.CompilerParams(
            dimension_semantics=("parallel",),   # v7x: 2 TCs split batch tiles
            vmem_limit_bytes=64 << 20,
        ),
    )(emb, w1, w2, w3, w4, bias)

    # Slice the zero padding back off only when padding actually exists.
    enc_out = enc_p if (Bp == B and Dp == D) else enc_p[:B, :D]
    dec_out = dec_p if (Bp == B and Mp == M) else dec_p[:B, :M]
    return enc_out, dec_out


def init_params(key, emb_dim, hidden_dim, msg_len):
    ks = jax.random.split(key, 4)
    scale = lambda fan_in: 1.0 / jnp.sqrt(jnp.float32(fan_in))
    return {
        # Encoder
        "w1": jax.random.normal(ks[0], (emb_dim, hidden_dim), jnp.float32) * scale(emb_dim),
        "b1": jnp.zeros((1, hidden_dim), jnp.float32),
        "w2": jax.random.normal(ks[1], (hidden_dim, emb_dim), jnp.float32) * scale(hidden_dim),
        "b2": jnp.zeros((1, emb_dim), jnp.float32),
        # Decoder
        "w3": jax.random.normal(ks[2], (emb_dim, hidden_dim), jnp.float32) * scale(emb_dim),
        "b3": jnp.zeros((1, hidden_dim), jnp.float32),
        "w4": jax.random.normal(ks[3], (hidden_dim, msg_len), jnp.float32) * scale(hidden_dim),
        "b4": jnp.zeros((1, msg_len), jnp.float32),
    }


def reference(embedding, p):
    """Plain-JAX reference mirroring the kernel's bf16-operand / f32-accumulate matmuls
    with an f32 residual path (embedding is NOT pre-rounded to bf16)."""
    bf16, f32 = jnp.bfloat16, jnp.float32
    mm = lambda a, b: jnp.dot(a.astype(bf16), b.astype(bf16), preferred_element_type=f32)
    emb = embedding.astype(f32)
    h1 = jnp.maximum(mm(emb, p["w1"]) + p["b1"], 0.0)
    enc = mm(h1, p["w2"]) + p["b2"] + emb
    h2 = jnp.maximum(mm(enc, p["w3"]) + p["b3"], 0.0)
    dec = jax.nn.sigmoid(mm(h2, p["w4"]) + p["b4"])
    return enc, dec


if __name__ == "__main__":
    B, D, H, M = 8, 32, 64, 16        # batch, embedding dim, hidden dim, message length

    key = jax.random.PRNGKey(0)
    k_emb, k_par = jax.random.split(key)
    embedding = jax.random.normal(k_emb, (B, D), jnp.float32)
    params = init_params(k_par, D, H, M)

    enc, dec = jax.jit(encoder_decoder)(embedding, params)
    jax.block_until_ready((enc, dec))

    enc_ref, dec_ref = reference(embedding, params)
    assert enc.shape == (B, D) and dec.shape == (B, M)
    # enc is stored as bf16 (perf: halves the dominant output writeback); compare
    # against the f32 reference with a bf16-rounding-sized tolerance.
    assert jnp.allclose(enc.astype(jnp.float32), enc_ref, atol=3e-2, rtol=1e-2), \
        float(jnp.max(jnp.abs(enc.astype(jnp.float32) - enc_ref)))
    assert jnp.allclose(dec.astype(jnp.float32), dec_ref, atol=2e-3, rtol=2e-3), \
        float(jnp.max(jnp.abs(dec.astype(jnp.float32) - dec_ref)))

    print("KERNEL_OK")
</pallas_src>

<mosaic_0001>
module attributes {stable_mosaic.version = 11 : i64} {
  func.func @_encdec_kernel(%arg0: i32, %arg1: memref<16x128xf32, #tpu.memory_space<vmem>>, %arg2: memref<128x128xbf16, #tpu.memory_space<vmem>>, %arg3: memref<128x128xbf16, #tpu.memory_space<vmem>>, %arg4: memref<128x128xbf16, #tpu.memory_space<vmem>>, %arg5: memref<128x128xbf16, #tpu.memory_space<vmem>>, %arg6: memref<8x128xf32, #tpu.memory_space<vmem>>, %arg7: memref<16x128xbf16, #tpu.memory_space<vmem>>, %arg8: memref<16x128xf32, #tpu.memory_space<vmem>>) attributes {dimension_semantics = [#tpu.dimension_semantics<parallel>], iteration_bounds = array<i64: 1>, scalar_prefetch = 0 : i64, scratch_operands = 0 : i64, tpu.core_type = #tpu.core_type<tc>, window_params = [{transform_indices = @transform_0, window_bounds = array<i64: 16, 128>}, {pipeline_mode = #tpu.pipeline_mode<synchronous>, transform_indices = @transform_1, window_bounds = array<i64: 128, 128>}, {pipeline_mode = #tpu.pipeline_mode<synchronous>, transform_indices = @transform_2, window_bounds = array<i64: 128, 128>}, {pipeline_mode = #tpu.pipeline_mode<synchronous>, transform_indices = @transform_3, window_bounds = array<i64: 128, 128>}, {pipeline_mode = #tpu.pipeline_mode<synchronous>, transform_indices = @transform_4, window_bounds = array<i64: 128, 128>}, {pipeline_mode = #tpu.pipeline_mode<synchronous>, transform_indices = @transform_5, window_bounds = array<i64: 8, 128>}, {transform_indices = @transform_6, window_bounds = array<i64: 16, 128>}, {transform_indices = @transform_7, window_bounds = array<i64: 16, 128>}]} {
    %c0 = arith.constant 0 : index
    %c0_0 = arith.constant 0 : index
    %0 = vector.load %arg1[%c0, %c0_0] : memref<16x128xf32, #tpu.memory_space<vmem>>, vector<16x128xf32>
    %1 = arith.truncf %0 : vector<16x128xf32> to vector<16x128xbf16>
    %c0_1 = arith.constant 0 : index
    %c0_2 = arith.constant 0 : index
    %2 = vector.load %arg6[%c0_1, %c0_2] : memref<8x128xf32, #tpu.memory_space<vmem>>, vector<8x128xf32>
    %3 = vector.extract_strided_slice %2 {offsets = [0, 0], sizes = [1, 128], strides = [1, 1]} : vector<8x128xf32> to vector<1x128xf32>
    %4 = vector.extract_strided_slice %2 {offsets = [1, 0], sizes = [1, 128], strides = [1, 1]} : vector<8x128xf32> to vector<1x128xf32>
    %5 = vector.extract_strided_slice %2 {offsets = [2, 0], sizes = [1, 128], strides = [1, 1]} : vector<8x128xf32> to vector<1x128xf32>
    %6 = vector.extract_strided_slice %2 {offsets = [3, 0], sizes = [1, 128], strides = [1, 1]} : vector<8x128xf32> to vector<1x128xf32>
    %c0_3 = arith.constant 0 : index
    %c0_4 = arith.constant 0 : index
    %7 = vector.load %arg2[%c0_3, %c0_4] : memref<128x128xbf16, #tpu.memory_space<vmem>>, vector<128x128xbf16>
    %cst = arith.constant dense<0.000000e+00> : vector<16x128xf32>
    %8 = tpu.matmul %1, %7, %cst {dimension_numbers = #tpu.dot_dimension_numbers<[1], [0], [0], [1], [0, 0, 1, 1], [], []>} : vector<16x128xbf16>, vector<128x128xbf16>, vector<16x128xf32> -> vector<16x128xf32>
    %9 = vector.broadcast %3 : vector<1x128xf32> to vector<16x128xf32>
    %10 = arith.addf %8, %9 : vector<16x128xf32>
    %cst_5 = arith.constant 0.000000e+00 : f32
    %11 = vector.broadcast %cst_5 : f32 to vector<16x128xf32>
    %12 = arith.maximumf %10, %11 : vector<16x128xf32>
    %13 = arith.truncf %12 : vector<16x128xf32> to vector<16x128xbf16>
    %c0_6 = arith.constant 0 : index
    %c0_7 = arith.constant 0 : index
    %14 = vector.load %arg3[%c0_6, %c0_7] : memref<128x128xbf16, #tpu.memory_space<vmem>>, vector<128x128xbf16>
    %cst_8 = arith.constant dense<0.000000e+00> : vector<16x128xf32>
    %15 = tpu.matmul %13, %14, %cst_8 {dimension_numbers = #tpu.dot_dimension_numbers<[1], [0], [0], [1], [0, 0, 1, 1], [], []>} : vector<16x128xbf16>, vector<128x128xbf16>, vector<16x128xf32> -> vector<16x128xf32>
    %16 = vector.broadcast %4 : vector<1x128xf32> to vector<16x128xf32>
    %17 = arith.addf %15, %16 : vector<16x128xf32>
    %18 = arith.addf %17, %0 : vector<16x128xf32>
    %19 = arith.truncf %18 : vector<16x128xf32> to vector<16x128xbf16>
    %c0_9 = arith.constant 0 : index
    %c0_10 = arith.constant 0 : index
    %20 = vector.load %arg7[%c0_9, %c0_10] : memref<16x128xbf16, #tpu.memory_space<vmem>>, vector<16x128xbf16>
    tpu.vector_store %arg7[%c0_9, %c0_10], %19 {strides = array<i32>} : memref<16x128xbf16, #tpu.memory_space<vmem>>, vector<16x128xbf16>,
    %21 = arith.truncf %18 : vector<16x128xf32> to vector<16x128xbf16>
    %c0_11 = arith.constant 0 : index
    %c0_12 = arith.constant 0 : index
    %22 = vector.load %arg4[%c0_11, %c0_12] : memref<128x128xbf16, #tpu.memory_space<vmem>>, vector<128x128xbf16>
    %cst_13 = arith.constant dense<0.000000e+00> : vector<16x128xf32>
    %23 = tpu.matmul %21, %22, %cst_13 {dimension_numbers = #tpu.dot_dimension_numbers<[1], [0], [0], [1], [0, 0, 1, 1], [], []>} : vector<16x128xbf16>, vector<128x128xbf16>, vector<16x128xf32> -> vector<16x128xf32>
    %24 = vector.broadcast %5 : vector<1x128xf32> to vector<16x128xf32>
    %25 = arith.addf %23, %24 : vector<16x128xf32>
    %cst_14 = arith.constant 0.000000e+00 : f32
    %26 = vector.broadcast %cst_14 : f32 to vector<16x128xf32>
    %27 = arith.maximumf %25, %26 : vector<16x128xf32>
    %28 = arith.truncf %27 : vector<16x128xf32> to vector<16x128xbf16>
    %c0_15 = arith.constant 0 : index
    %c0_16 = arith.constant 0 : index
    %29 = vector.load %arg5[%c0_15, %c0_16] : memref<128x128xbf16, #tpu.memory_space<vmem>>, vector<128x128xbf16>
    %cst_17 = arith.constant dense<0.000000e+00> : vector<16x128xf32>
    %30 = tpu.matmul %28, %29, %cst_17 {dimension_numbers = #tpu.dot_dimension_numbers<[1], [0], [0], [1], [0, 0, 1, 1], [], []>} : vector<16x128xbf16>, vector<128x128xbf16>, vector<16x128xf32> -> vector<16x128xf32>
    %31 = vector.broadcast %6 : vector<1x128xf32> to vector<16x128xf32>
    %32 = arith.addf %30, %31 : vector<16x128xf32>
    %33 = arith.negf %32 : vector<16x128xf32>
    %34 = math.exp %33 : vector<16x128xf32>
    %cst_18 = arith.constant 1.000000e+00 : f32
    %35 = vector.broadcast %cst_18 : f32 to vector<16x128xf32>
    %36 = arith.addf %35, %34 : vector<16x128xf32>
    %37 = arith.divf %35, %36 : vector<16x128xf32>
    %c0_19 = arith.constant 0 : index
    %c0_20 = arith.constant 0 : index
    %38 = vector.load %arg8[%c0_19, %c0_20] : memref<16x128xf32, #tpu.memory_space<vmem>>, vector<16x128xf32>
    tpu.vector_store %arg8[%c0_19, %c0_20], %37 {strides = array<i32>} : memref<16x128xf32, #tpu.memory_space<vmem>>, vector<16x128xf32>,
    return
  }
  func.func @transform_0(%arg0: i32) -> (i32, i32) {
    %c0_i32 = arith.constant 0 : i32
    %c0_i32_0 = arith.constant 0 : i32
    return %arg0, %c0_i32 : i32, i32
  }
  func.func @transform_1(%arg0: i32) -> (i32, i32) {
    %c0_i32 = arith.constant 0 : i32
    %c0_i32_0 = arith.constant 0 : i32
    %c0_i32_1 = arith.constant 0 : i32
    return %c0_i32, %c0_i32_0 : i32, i32
  }
  func.func @transform_2(%arg0: i32) -> (i32, i32) {
    %c0_i32 = arith.constant 0 : i32
    %c0_i32_0 = arith.constant 0 : i32
    %c0_i32_1 = arith.constant 0 : i32
    return %c0_i32, %c0_i32_0 : i32, i32
  }
  func.func @transform_3(%arg0: i32) -> (i32, i32) {
    %c0_i32 = arith.constant 0 : i32
    %c0_i32_0 = arith.constant 0 : i32
    %c0_i32_1 = arith.constant 0 : i32
    return %c0_i32, %c0_i32_0 : i32, i32
  }
  func.func @transform_4(%arg0: i32) -> (i32, i32) {
    %c0_i32 = arith.constant 0 : i32
    %c0_i32_0 = arith.constant 0 : i32
    %c0_i32_1 = arith.constant 0 : i32
    return %c0_i32, %c0_i32_0 : i32, i32
  }
  func.func @transform_5(%arg0: i32) -> (i32, i32) {
    %c0_i32 = arith.constant 0 : i32
    %c0_i32_0 = arith.constant 0 : i32
    %c0_i32_1 = arith.constant 0 : i32
    return %c0_i32, %c0_i32_0 : i32, i32
  }
  func.func @transform_6(%arg0: i32) -> (i32, i32) {
    %c0_i32 = arith.constant 0 : i32
    %c0_i32_0 = arith.constant 0 : i32
    return %arg0, %c0_i32 : i32, i32
  }
  func.func @transform_7(%arg0: i32) -> (i32, i32) {
    %c0_i32 = arith.constant 0 : i32
    %c0_i32_0 = arith.constant 0 : i32
    return %arg0, %c0_i32 : i32, i32
  }
}

</mosaic_0001>

<bundles_post_ra>
// kernel: encoder_decoder.1
= control target key start
LH: loop header
LB: loop body
LE: loop exit
PB: predicated region body
PF: predicated region fallthrough
CT: control target
= control target key end

     0   :  { %v707_v0 = vmov 0.0   ;;  %vm708_vm0 = vmmov 0   ;;  %v46_v25 = vlaneseq  ;;  %s923_s1 = inlined_call_operand.vmem [shape: bf16[128,128], index: 1, kind: input, shape index: {}]   ;;  %s924_s2 = inlined_call_operand.vmem [shape: bf16[128,128], index: 2, kind: input, shape index: {}]   ;;  %s925_s0 = inlined_call_operand.vmem [shape: f32[16,128], index: 0, kind: input, shape index: {}]   ;;  %s926_s3 = inlined_call_operand.vmem [shape: bf16[128,128], index: 3, kind: input, shape index: {}]   ;;  %s927_s5 = inlined_call_operand.vmem [shape: f32[8,128], index: 5, kind: input, shape index: {}]   ;;  %s928_s4 = inlined_call_operand.vmem [shape: bf16[128,128], index: 4, kind: input, shape index: {}]   ;;  %s929_s6 = inlined_call_operand.vmem [shape: bf16[16,128], index: 6, kind: output, shape index: {0}]   ;;  %s930_s7 = inlined_call_operand.vmem [shape: f32[16,128], index: 7, kind: output, shape index: {1}]  }
   0x1   :  { %585 = vmatprep.subr.bf16.mxu0 %v707_v0  ;;  %v667_v1 = vld [vmem:[%s923_s1 + $0x38] sm:$0xff]   ;;  %601 = vmatprep.mubr.msk.bf16.mxu0 %vm708_vm0, %v707_v0  ;;  %v668_v2 = vld [vmem:[%s923_s1 + $0x30] sm:$0xff]   ;;  %v669_v3 = vld [vmem:[%s923_s1 + $0x28] sm:$0xff]  }
   0x2   :  { %605 = vmatprep.subr.bf16.mxu1 %v707_v0  ;;  %621 = vmatprep.mubr.msk.bf16.mxu1 %vm708_vm0, %v707_v0  ;;  %v675_v4 = vld [vmem:[%s924_s2 + $0x38] sm:$0xff]   ;;  %v670_v5 = vld [vmem:[%s923_s1 + $0x20] sm:$0xff]   ;;  %v676_v6 = vld [vmem:[%s924_s2 + $0x30] sm:$0xff]   ;;  %v853_v26 = vshrl.u32 %v46_v25, 7 }
   0x3   :  { %586 = vmatpush3.bf16.msra.mxu0 %v667_v1  ;;  %606 = vmatpush3.bf16.msra.mxu1 %v675_v4  ;;  %v671_v7 = vld [vmem:[%s923_s1 + $0x18] sm:$0xff]   ;;  %v677_v8 = vld [vmem:[%s924_s2 + $0x28] sm:$0xff]   ;;  %v672_v9 = vld [vmem:[%s923_s1 + $0x10] sm:$0xff]  }
   0x4   :  { %587 = vmatprep.subr.bf16.mxu0 %v707_v0  ;;  %607 = vmatprep.subr.bf16.mxu1 %v707_v0  ;;  %v678_v10 = vld [vmem:[%s924_s2 + $0x20] sm:$0xff]   ;;  %v673_v11 = vld [vmem:[%s923_s1 + $0x8] sm:$0xff]   ;;  %v679_v12 = vld [vmem:[%s924_s2 + $0x18] sm:$0xff]   ;;  %v48_v27 = vsub.s32 0, %v853_v26  ;;  %v160_v47 = vsub.s32 1, %v853_v26  ;;  %v281_v61 = vsub.s32 2, %v853_v26 }
   0x5   :  { %v674_v13 = vld [vmem:[%s923_s1] sm:$0xff]   ;;  %v812_v15 = vld [vmem:[%s925_s0 + $0x8] sm:$0xff]  ;;  %v680_v17 = vld [vmem:[%s924_s2 + $0x10] sm:$0xff]  }
   0x6   :  { %v807_v14 = vld [vmem:[%s925_s0] sm:$0xff]  ;;  %v681_v18 = vld [vmem:[%s924_s2 + $0x8] sm:$0xff]   ;;  %v683_v20 = vld [vmem:[%s926_s3 + $0x38] sm:$0xff]  }
   0x7   :  { %588 = vmatpush3.bf16.msra.mxu0 %v668_v2  ;;  %608 = vmatpush3.bf16.msra.mxu1 %v676_v6  ;;  %v28_v16 = vpack.c.bf16 %v812_v15, %v807_v14  ;;  %v682_v19 = vld [vmem:[%s924_s2] sm:$0xff]   ;;  %v684_v21 = vld [vmem:[%s926_s3 + $0x30] sm:$0xff]   ;;  %v685_v22 = vld [vmem:[%s926_s3 + $0x28] sm:$0xff]  }
   0x8   :  { %589 = vmatprep.subr.bf16.mxu0 %v707_v0  ;;  %609 = vmatprep.subr.bf16.mxu1 %v707_v0  ;;  %v686_v23 = vld [vmem:[%s926_s3 + $0x20] sm:$0xff]   ;;  %v687_v24 = vld [vmem:[%s926_s3 + $0x18] sm:$0xff]   ;;  %v688_v39 = vld [vmem:[%s926_s3 + $0x10] sm:$0xff]  }
   0x9   :  { %v859_v28 = vld [vmem:[%s927_s5] sm:$0xff]  ;;  %v689_v40 = vld [vmem:[%s926_s3 + $0x8] sm:$0xff]   ;;  %v691_v42 = vld [vmem:[%s928_s4 + $0x38] sm:$0xff]  }
   0xa   :  { %v49_v29 = vrot.slane %v859_v28, %v48_v27  ;;  %v690_v41 = vld [vmem:[%s926_s3] sm:$0xff]   ;;  %v692_v43 = vld [vmem:[%s928_s4 + $0x30] sm:$0xff]   ;;  %v693_v44 = vld [vmem:[%s928_s4 + $0x28] sm:$0xff]   ;;  %v161_v48 = vrot.slane %v859_v28, %v160_v47  ;;  %v282_v62 = vrot.slane %v859_v28, %v281_v61 }
   0xb   :  { %590 = vmatpush3.bf16.msra.mxu0 %v669_v3  ;;  %610 = vmatpush3.bf16.msra.mxu1 %v677_v8  ;;  %v694_v45 = vld [vmem:[%s928_s4 + $0x20] sm:$0xff]   ;;  %v695_v46 = vld [vmem:[%s928_s4 + $0x18] sm:$0xff]   ;;  %v696_v58 = vld [vmem:[%s928_s4 + $0x10] sm:$0xff]  }
   0xc   :  { %591 = vmatprep.subr.bf16.mxu0 %v707_v0  ;;  %611 = vmatprep.subr.bf16.mxu1 %v707_v0  ;;  %v697_v59 = vld [vmem:[%s928_s4 + $0x8] sm:$0xff]   ;;  %v698_v60 = vld [vmem:[%s928_s4] sm:$0xff]  }
   0xf   :  { %592 = vmatpush3.bf16.msra.mxu0 %v670_v5  ;;  %612 = vmatpush3.bf16.msra.mxu1 %v678_v10 }
  0x10   :  { %593 = vmatprep.subr.bf16.mxu0 %v707_v0  ;;  %613 = vmatprep.subr.bf16.mxu1 %v707_v0 }
  0x13   :  { %594 = vmatpush3.bf16.msra.mxu0 %v671_v7  ;;  %614 = vmatpush3.bf16.msra.mxu1 %v679_v12 }
  0x14   :  { %595 = vmatprep.subr.bf16.mxu0 %v707_v0  ;;  %615 = vmatprep.subr.bf16.mxu1 %v707_v0 }
  0x17   :  { %596 = vmatpush3.bf16.msra.mxu0 %v672_v9  ;;  %616 = vmatpush3.bf16.msra.mxu1 %v680_v17 }
  0x18   :  { %597 = vmatprep.subr.bf16.mxu0 %v707_v0  ;;  %617 = vmatprep.subr.bf16.mxu1 %v707_v0 }
  0x1b   :  { %598 = vmatpush3.bf16.msra.mxu0 %v673_v11  ;;  %618 = vmatpush3.bf16.msra.mxu1 %v681_v18 }
  0x1c   :  { %599 = vmatprep.subr.bf16.mxu0 %v707_v0  ;;  %619 = vmatprep.subr.bf16.mxu1 %v707_v0 }
  0x1f   :  { %600 = vmatpush3.bf16.msra.mxu0 %v674_v13  ;;  %620 = vmatpush3.bf16.msra.mxu1 %v682_v19 }
  0x20   :  { %625 = vmatprep.subr.bf16.mxu0 %v707_v0  ;;  %645 = vmatprep.subr.bf16.mxu1 %v707_v0 }
  0x22   :  { %602 = vmatmul.mubr.bf16.vlgmr.msra.gmra.mxu0 %v28_v16 }
  0x23   :  { %641 = vmatprep.mubr.msk.bf16.mxu0 %vm708_vm0, %v707_v0  ;;  %626 = vmatpush3.bf16.msra.mxu0 %v683_v20 }
  0x24   :  { %627 = vmatprep.subr.bf16.mxu0 %v707_v0 }
  0x27   :  { %628 = vmatpush3.bf16.msra.mxu0 %v684_v21 }
  0x28   :  { %629 = vmatprep.subr.bf16.mxu0 %v707_v0 }
  0x2b   :  { %630 = vmatpush3.bf16.msra.mxu0 %v685_v22 }
  0x2c   :  { %631 = vmatprep.subr.bf16.mxu0 %v707_v0 }
  0x2f   :  { %632 = vmatpush3.bf16.msra.mxu0 %v686_v23 }
  0x30   :  { %633 = vmatprep.subr.bf16.mxu0 %v707_v0 }
  0x33   :  { %634 = vmatpush3.bf16.msra.mxu0 %v687_v24 }
  0x34   :  { %635 = vmatprep.subr.bf16.mxu0 %v707_v0 }
  0x37   :  { %636 = vmatpush3.bf16.msra.mxu0 %v688_v39 }
  0x38   :  { %637 = vmatprep.subr.bf16.mxu0 %v707_v0 }
  0x3b   :  { %638 = vmatpush3.bf16.msra.mxu0 %v689_v40 }
  0x3c   :  { %639 = vmatprep.subr.bf16.mxu0 %v707_v0 }
  0x3f   :  { %640 = vmatpush3.bf16.msra.mxu0 %v690_v41 }
  0xe2   :  { %v132_v30 = vpop.f32.mrf.mxu0 }
  0xe3   :  { %v133_v32 = vadd.f32 %v132_v30, %v49_v29 }
  0xe4   :  { %v603_v31 = vpop.f32.mrf.mxu0 }
  0xe5   :  { %v139_v36 = vmax.f32 %v133_v32, 0.0 }
  0xe6   :  { %v135_v33 = vpop.f32.mrf.mxu0 }
  0xe7   :  { %v136_v34 = vadd.f32 %v135_v33, %v49_v29 }
  0xe8   :  { %v604_v35 = vpop.f32.mrf.mxu0 }
  0xe9   :  { %v140_v37 = vmax.f32 %v136_v34, 0.0 }
  0xeb   :  { %v141_v38 = vpack.c.bf16 %v140_v37, %v139_v36 }
  0xed   :  { %622 = vmatmul.mubr.bf16.vlgmr.msra.gmra.mxu1 %v141_v38 }
  0xee   :  { %661 = vmatprep.mubr.msk.bf16.mxu1 %vm708_vm0, %v707_v0  ;;  %646 = vmatpush3.bf16.msra.mxu1 %v691_v42 }
  0xef   :  { %647 = vmatprep.subr.bf16.mxu1 %v707_v0 }
  0xf2   :  { %648 = vmatpush3.bf16.msra.mxu1 %v692_v43 }
  0xf3   :  { %649 = vmatprep.subr.bf16.mxu1 %v707_v0 }
  0xf6   :  { %650 = vmatpush3.bf16.msra.mxu1 %v693_v44 }
  0xf7   :  { %651 = vmatprep.subr.bf16.mxu1 %v707_v0 }
  0xfa   :  { %652 = vmatpush3.bf16.msra.mxu1 %v694_v45 }
  0xfb   :  { %653 = vmatprep.subr.bf16.mxu1 %v707_v0 }
  0xfe   :  { %654 = vmatpush3.bf16.msra.mxu1 %v695_v46 }
  0xff   :  { %655 = vmatprep.subr.bf16.mxu1 %v707_v0 }
 0x102   :  { %656 = vmatpush3.bf16.msra.mxu1 %v696_v58 }
 0x103   :  { %657 = vmatprep.subr.bf16.mxu1 %v707_v0 }
 0x106   :  { %658 = vmatpush3.bf16.msra.mxu1 %v697_v59 }
 0x107   :  { %659 = vmatprep.subr.bf16.mxu1 %v707_v0  ;;  %v393_v0 = vsub.s32 3, %v853_v26 }
 0x109   :  { %v394_v9 = vrot.slane %v859_v28, %v393_v0 }
 0x10a   :  { %660 = vmatpush3.bf16.msra.mxu1 %v698_v60 }
 0x1ad   :  { %v244_v49 = vpop.f32.mrf.mxu1 }
 0x1ae   :  { %v245_v51 = vadd.f32 %v244_v49, %v161_v48 }
 0x1af   :  { %v623_v50 = vpop.f32.mrf.mxu1 }
 0x1b0   :  { %v251_v55 = vadd.f32 %v245_v51, %v807_v14 }
 0x1b1   :  { %v247_v52 = vpop.f32.mrf.mxu1 }
 0x1b2   :  { %v248_v53 = vadd.f32 %v247_v52, %v161_v48 }
 0x1b3   :  { %v624_v54 = vpop.f32.mrf.mxu1 }
 0x1b4   :  { %v252_v56 = vadd.f32 %v248_v53, %v812_v15 }
 0x1b6   :  { %v253_v57 = vpack.c.bf16 %v252_v56, %v251_v55 }
 0x1b8   :  { %548 = vst [vmem:[%s929_s6] sm:$0xff] %v253_v57   ;;  %642 = vmatmul.mubr.bf16.vlgmr.msra.gmra.mxu0 %v253_v57 }
 0x278   :  { %v365_v63 = vpop.f32.mrf.mxu0 }
 0x279   :  { %v366_v2 = vadd.f32 %v365_v63, %v282_v62 }
 0x27a   :  { %v643_v1 = vpop.f32.mrf.mxu0 }
 0x27b   :  { %v372_v6 = vmax.f32 %v366_v2, 0.0 }
 0x27c   :  { %v368_v3 = vpop.f32.mrf.mxu0 }
 0x27d   :  { %v369_v4 = vadd.f32 %v368_v3, %v282_v62 }
 0x27e   :  { %v644_v5 = vpop.f32.mrf.mxu0 }
 0x27f   :  { %v373_v7 = vmax.f32 %v369_v4, 0.0 }
 0x281   :  { %v374_v8 = vpack.c.bf16 %v373_v7, %v372_v6 }
 0x283   :  { %662 = vmatmul.mubr.bf16.vlgmr.msra.gmra.mxu1 %v374_v8 }
 0x343   :  { %v477_v10 = vpop.f32.mrf.mxu1 }
 0x344   :  { %v478_v11 = vadd.f32 %v477_v10, %v394_v9 }
 0x345   :  { %v663_v12 = vpop.f32.mrf.mxu1 }
 0x346   :  { %v540_v13 = vmul.f32 -1.442695, %v478_v11 }
 0x347   :  { %v480_v14 = vpop.f32.mrf.mxu1 }
 0x348   :  { %699 = vpow2.f32 %v540_v13  ;;  %v481_v15 = vadd.f32 %v480_v14, %v394_v9 }
 0x349   :  { %v664_v16 = vpop.f32.mrf.mxu1 }
 0x34a   :  { %v541_v17 = vmul.f32 -1.442695, %v481_v15 }
 0x34c   :  { %701 = vpow2.f32 %v541_v17 }
 0x355   :  { %v700_v18 = vpop.eup %699 }
 0x356   :  { %v490_v19 = vadd.f32 1.0, %v700_v18 }
 0x358   :  { %703 = vrcp.f32 %v490_v19 }
 0x359   :  { %v702_v20 = vpop.eup %701 }
 0x35a   :  { %v491_v21 = vadd.f32 1.0, %v702_v20 }
 0x35c   :  { %705 = vrcp.f32 %v491_v21 }
 0x365   :  { %v704_v22 = vpop.eup %703 }
 0x366   :  { %496 = vst [vmem:[%s930_s7] sm:$0xff] %v704_v22 }
 0x369   :  { %v706_v23 = vpop.eup %705 }
 0x36a   :  { %497 = vst [vmem:[%s930_s7 + $0x8] sm:$0xff] %v706_v23 }

</bundles_post_ra>
